<compile_context>
chip_gen: v5e
topology: v5e:2x2
jax: 0.10.0
libtpu: 0.0.40
codegen_flags: <defaults>
</compile_context>

<pallas_src>
import math
import jax
import jax.numpy as jnp
from jax.experimental import pallas as pl
from jax.experimental.pallas import tpu as pltpu


def _softplus(x):
    # numerically stable softplus: max(x,0) + log(1 + exp(-|x|))
    return jnp.maximum(x, 0.0) + jnp.log(1.0 + jnp.exp(-jnp.abs(x)))


def _silu(x):
    return x * jax.nn.sigmoid(x)


def mamba_layer_kernel(x_ref, w_in_ref, conv_w_ref, conv_b_ref, w_xproj_ref,
                       w_dt_ref, b_dt_ref, a_neg_t_ref, d_ref, w_out_ref,
                       gamma_ref, beta_ref, out_ref,
                       xpad_scr, dA_scr, dBx_scr, h_scr, y_scr):
    f32 = jnp.float32
    bf16 = jnp.bfloat16

    x = x_ref[...]                                    # (L, D) fp32
    L = x.shape[0]
    K, E = conv_w_ref.shape                           # d_conv, d_inner
    N = a_neg_t_ref.shape[0]                          # d_state
    chunk = dA_scr.shape[0]
    nchunks = L // chunk

    # ---- fused in_proj: x @ [W_x | W_z]  (bf16 MXU, fp32 accumulate) ----
    xz = jnp.dot(x.astype(bf16), w_in_ref[...], preferred_element_type=f32)  # (L, 2E)
    xp = xz[:, :E]                                    # x-branch
    z = xz[:, E:]                                     # gate branch

    # ---- causal depthwise conv1d via zero-padded scratch, then SiLU ----
    conv_w = conv_w_ref[...]                          # (K, E)
    if K > 1:
        xpad_scr[:K - 1, :] = jnp.zeros((K - 1, E), f32)
    xpad_scr[K - 1:, :] = xp                          # rows K-1 .. K-2+L
    acc = xpad_scr[K - 1:K - 1 + L, :] * conv_w[K - 1:K, :]
    for k in range(K - 1):                            # static, K is tiny
        acc = acc + xpad_scr[k:k + L, :] * conv_w[k:k + 1, :]
    xc = _silu(acc + conv_b_ref[...])                 # (L, E) fp32

    # ---- fused x_proj: xc @ [W_B | W_C | W_dt_in]; dt_proj + softplus ----
    xproj = jnp.dot(xc.astype(bf16), w_xproj_ref[...],
                    preferred_element_type=f32)       # (L, 2N + R)
    Bmat = xproj[:, :N]                               # (L, N)
    Cmat = xproj[:, N:2 * N]                          # (L, N)
    dt_low = xproj[:, 2 * N:]                         # (L, R)
    dt = _softplus(jnp.dot(dt_low.astype(bf16), w_dt_ref[...],
                           preferred_element_type=f32) + b_dt_ref[...])  # (L, E)

    # ---- selective scan: state in (N, E) layout, heavy work hoisted ----
    A_T = a_neg_t_ref[...]                            # (N, E) == -exp(A_log).T
    h = jnp.zeros((N, E), f32)
    for c in range(nchunks):                          # static chunk loop
        lo = c * chunk
        dt_c = dt[lo:lo + chunk, :]                   # (C, E)
        dBu_c = dt_c * xc[lo:lo + chunk, :]           # (C, E)
        Cmat_c = Cmat[lo:lo + chunk, :]               # (C, N)
        # vectorized precompute (off the serial dependence chain)
        dA_scr[...] = jnp.exp(dt_c[:, None, :] * A_T[None, :, :])       # (C, N, E)
        dBx_scr[...] = dBu_c[:, None, :] * Bmat[lo:lo + chunk, :][:, :, None]

        def body(t, h):
            h = dA_scr[t] * h + dBx_scr[t]            # (N, E) VPU FMA chain
            h_scr[t] = h                              # store is off the chain
            return h

        h = jax.lax.fori_loop(0, chunk, body, h)

        # y_t = sum_n C[t, n] * h[t, n, :]  -- vectorized over the chunk,
        # done once per chunk (VPU multiply + sublane reduce), not per step.
        y_scr[lo:lo + chunk, :] = jnp.sum(
            h_scr[...] * Cmat_c[:, :, None], axis=1)  # (C, E)

    y = y_scr[...] + xc * d_ref[...]                  # skip term D * x
    y = y * _silu(z)                                  # gate

    # ---- out_proj + residual + LayerNorm(d_model) ----
    mamba_out = jnp.dot(y.astype(bf16), w_out_ref[...],
                        preferred_element_type=f32)   # (L, D)
    res = x + mamba_out
    mean = jnp.mean(res, axis=-1, keepdims=True)
    var = jnp.mean((res - mean) ** 2, axis=-1, keepdims=True)
    normed = (res - mean) * jax.lax.rsqrt(var + 1e-5)
    out_ref[...] = (normed * gamma_ref[...] + beta_ref[...]).astype(out_ref.dtype)


def _pick_chunk(L, N, E, budget_bytes=6 << 20):
    """Largest divisor of L (<=128) whose 3x (chunk,N,E) f32 scratch fits budget."""
    per_row = 3 * N * E * 4
    cap = int(max(1, min(128, L, budget_bytes // per_row)))
    for c in range(cap, 0, -1):
        if L % c == 0:
            return c
    return 1


def mamba_layer(x, params):
    B, L, D = x.shape
    E = params["w_in_x"].shape[1]
    N = params["a_log"].shape[1]
    K = params["conv_w"].shape[0]
    bf = jnp.bfloat16

    # Fuse / pre-layout weights once on the host side (XLA ops, not in-kernel).
    w_in = jnp.concatenate([params["w_in_x"], params["w_in_z"]], axis=1).astype(bf)
    w_xproj = jnp.concatenate([params["w_B"], params["w_C"], params["w_dtin"]],
                              axis=1).astype(bf)
    w_dt = params["w_dt"].astype(bf)
    w_out = params["w_out"].astype(bf)
    a_neg_t = (-jnp.exp(params["a_log"].astype(jnp.float32))).T   # (N, E), -exp(A_log).T
    conv_w = params["conv_w"].astype(jnp.float32)
    conv_b = params["conv_b"].astype(jnp.float32)
    b_dt = params["b_dt"].astype(jnp.float32)
    d_skip = params["d"].astype(jnp.float32)
    gamma = params["gamma"].astype(jnp.float32)
    beta = params["beta"].astype(jnp.float32)
    weights = [w_in, conv_w, conv_b, w_xproj, w_dt, b_dt, a_neg_t, d_skip,
               w_out, gamma, beta]

    chunk = _pick_chunk(L, N, E)
    assert L % chunk == 0

    vmem_weight_spec = pl.BlockSpec(memory_space=pltpu.MemorySpace.VMEM)
    in_specs = [pl.BlockSpec((None, L, D), lambda b: (b, 0, 0))]
    in_specs += [vmem_weight_spec] * len(weights)
    out_spec = pl.BlockSpec((None, L, D), lambda b: (b, 0, 0))

    scratch_shapes = [
        pltpu.VMEM((L + K - 1, E), jnp.float32),   # zero-padded conv input
        pltpu.VMEM((chunk, N, E), jnp.float32),    # dA chunk
        pltpu.VMEM((chunk, N, E), jnp.float32),    # dBx chunk
        pltpu.VMEM((chunk, N, E), jnp.float32),    # h states for the chunk
        pltpu.VMEM((L, E), jnp.float32),           # scan outputs y
    ]

    try:
        vmem_limit = int(pltpu.get_tpu_info().vmem_capacity_bytes * 3 // 4)
    except Exception:
        vmem_limit = None
    cp_kwargs = dict(dimension_semantics=("parallel",))
    if vmem_limit:
        cp_kwargs["vmem_limit_bytes"] = vmem_limit

    return pl.pallas_call(
        mamba_layer_kernel,
        out_shape=jax.ShapeDtypeStruct((B, L, D), x.dtype),
        grid_spec=pltpu.PrefetchScalarGridSpec(
            num_scalar_prefetch=0, grid=(B,),
            in_specs=in_specs, out_specs=out_spec,
            scratch_shapes=scratch_shapes),
        compiler_params=pltpu.CompilerParams(**cp_kwargs),
    )(x, *weights)


def init_params(key, d_model, d_state=16, d_conv=4, expand=2):
    E = expand * d_model
    R = math.ceil(d_model / 16)                        # dt_rank
    ks = jax.random.split(key, 9)
    s = 0.1
    p = {}
    p["w_in_x"] = s * jax.random.normal(ks[0], (d_model, E), jnp.float32)
    p["w_in_z"] = s * jax.random.normal(ks[1], (d_model, E), jnp.float32)
    p["conv_w"] = s * jax.random.normal(ks[2], (d_conv, E), jnp.float32)
    p["conv_b"] = s * jax.random.normal(ks[3], (1, E), jnp.float32)
    p["w_dtin"] = s * jax.random.normal(ks[4], (E, R), jnp.float32)
    p["w_B"] = s * jax.random.normal(ks[5], (E, d_state), jnp.float32)
    p["w_C"] = s * jax.random.normal(ks[6], (E, d_state), jnp.float32)
    p["w_dt"] = s * jax.random.normal(ks[7], (R, E), jnp.float32)
    p["b_dt"] = jnp.full((1, E), math.log(math.expm1(0.01)), jnp.float32)
    p["a_log"] = jnp.log(
        jnp.tile(jnp.arange(1, d_state + 1, dtype=jnp.float32), (E, 1)))
    p["d"] = jnp.ones((1, E), jnp.float32)
    p["w_out"] = s * jax.random.normal(ks[8], (E, d_model), jnp.float32)
    p["gamma"] = jnp.ones((1, d_model), jnp.float32)
    p["beta"] = jnp.zeros((1, d_model), jnp.float32)
    return p


def mamba_layer_ref(x, p):
    """Pure-JAX fp32 reference, same math, vectorized over batch."""
    hp = jax.lax.Precision.HIGHEST
    B, L, D = x.shape
    E = p["w_in_x"].shape[1]
    N = p["a_log"].shape[1]
    K = p["conv_w"].shape[0]
    xp = jnp.einsum("bld,de->ble", x, p["w_in_x"], precision=hp)
    z = jnp.einsum("bld,de->ble", x, p["w_in_z"], precision=hp)
    pad = jnp.pad(xp, ((0, 0), (K - 1, 0), (0, 0)))
    conv = sum(pad[:, k:k + L, :] * p["conv_w"][k][None, None, :] for k in range(K))
    xc = _silu(conv + p["conv_b"][None])
    dt_low = jnp.einsum("ble,er->blr", xc, p["w_dtin"], precision=hp)
    dt = _softplus(jnp.einsum("blr,re->ble", dt_low, p["w_dt"], precision=hp)
                   + p["b_dt"][None])
    Bm = jnp.einsum("ble,en->bln", xc, p["w_B"], precision=hp)
    Cm = jnp.einsum("ble,en->bln", xc, p["w_C"], precision=hp)
    A = -jnp.exp(p["a_log"])
    h = jnp.zeros((B, E, N), jnp.float32)
    ys = []
    for t in range(L):
        dA = jnp.exp(dt[:, t, :, None] * A[None])
        dBx = (dt[:, t, :] * xc[:, t, :])[:, :, None] * Bm[:, t, None, :]
        h = dA * h + dBx
        ys.append(jnp.sum(h * Cm[:, t, None, :], axis=-1))
    y = jnp.stack(ys, axis=1)                          # (B, L, E)
    y = y + xc * p["d"][None]
    y = y * _silu(z)
    out = jnp.einsum("ble,ed->bld", y, p["w_out"], precision=hp)
    res = x + out
    mean = jnp.mean(res, axis=-1, keepdims=True)
    var = jnp.mean((res - mean) ** 2, axis=-1, keepdims=True)
    return (res - mean) * jax.lax.rsqrt(var + 1e-5) * p["gamma"][None] + p["beta"][None]


if __name__ == "__main__":
    B, L, D = 2, 8, 32                                 # batch, seq, d_model
    key = jax.random.PRNGKey(0)
    kx, kp = jax.random.split(key)
    x = jax.random.normal(kx, (B, L, D), jnp.float32)
    params = init_params(kp, D)

    out = mamba_layer(x, params)
    out = jax.block_until_ready(out)

    ref = mamba_layer_ref(x, params)
    err = float(jnp.max(jnp.abs(out - ref)))
    assert out.shape == (B, L, D)
    assert err < 3e-2, f"max abs error vs reference: {err}"
    print("KERNEL_OK")
</pallas_src>

<mosaic_0001>
module attributes {stable_mosaic.version = 11 : i64} {
  func.func @mamba_layer_kernel(%arg0: i32, %arg1: memref<1x8x32xf32, #tpu.memory_space<vmem>>, %arg2: memref<32x128xbf16, #tpu.memory_space<vmem>>, %arg3: memref<4x64xf32, #tpu.memory_space<vmem>>, %arg4: memref<1x64xf32, #tpu.memory_space<vmem>>, %arg5: memref<64x34xbf16, #tpu.memory_space<vmem>>, %arg6: memref<2x64xbf16, #tpu.memory_space<vmem>>, %arg7: memref<1x64xf32, #tpu.memory_space<vmem>>, %arg8: memref<16x64xf32, #tpu.memory_space<vmem>>, %arg9: memref<1x64xf32, #tpu.memory_space<vmem>>, %arg10: memref<64x32xbf16, #tpu.memory_space<vmem>>, %arg11: memref<1x32xf32, #tpu.memory_space<vmem>>, %arg12: memref<1x32xf32, #tpu.memory_space<vmem>>, %arg13: memref<1x8x32xf32, #tpu.memory_space<vmem>>, %arg14: memref<11x64xf32, #tpu.memory_space<vmem>>, %arg15: memref<8x16x64xf32, #tpu.memory_space<vmem>>, %arg16: memref<8x16x64xf32, #tpu.memory_space<vmem>>, %arg17: memref<8x16x64xf32, #tpu.memory_space<vmem>>, %arg18: memref<8x64xf32, #tpu.memory_space<vmem>>) attributes {dimension_semantics = [#tpu.dimension_semantics<parallel>], iteration_bounds = array<i64: 2>, scalar_prefetch = 0 : i64, scratch_operands = 5 : i64, tpu.core_type = #tpu.core_type<tc>, window_params = [{transform_indices = @transform_0, window_bounds = array<i64: 1, 8, 32>}, {pipeline_mode = #tpu.pipeline_mode<synchronous>, transform_indices = @transform_1, window_bounds = array<i64: 32, 128>}, {pipeline_mode = #tpu.pipeline_mode<synchronous>, transform_indices = @transform_2, window_bounds = array<i64: 4, 64>}, {pipeline_mode = #tpu.pipeline_mode<synchronous>, transform_indices = @transform_3, window_bounds = array<i64: 1, 64>}, {pipeline_mode = #tpu.pipeline_mode<synchronous>, transform_indices = @transform_4, window_bounds = array<i64: 64, 34>}, {pipeline_mode = #tpu.pipeline_mode<synchronous>, transform_indices = @transform_5, window_bounds = array<i64: 2, 64>}, {pipeline_mode = #tpu.pipeline_mode<synchronous>, transform_indices = @transform_6, window_bounds = array<i64: 1, 64>}, {pipeline_mode = #tpu.pipeline_mode<synchronous>, transform_indices = @transform_7, window_bounds = array<i64: 16, 64>}, {pipeline_mode = #tpu.pipeline_mode<synchronous>, transform_indices = @transform_8, window_bounds = array<i64: 1, 64>}, {pipeline_mode = #tpu.pipeline_mode<synchronous>, transform_indices = @transform_9, window_bounds = array<i64: 64, 32>}, {pipeline_mode = #tpu.pipeline_mode<synchronous>, transform_indices = @transform_10, window_bounds = array<i64: 1, 32>}, {pipeline_mode = #tpu.pipeline_mode<synchronous>, transform_indices = @transform_11, window_bounds = array<i64: 1, 32>}, {transform_indices = @transform_12, window_bounds = array<i64: 1, 8, 32>}]} {
    %c0 = arith.constant 0 : index
    %c0_0 = arith.constant 0 : index
    %c0_1 = arith.constant 0 : index
    %0 = vector.load %arg1[%c0, %c0_0, %c0_1] : memref<1x8x32xf32, #tpu.memory_space<vmem>>, vector<1x8x32xf32>
    %1 = vector.shape_cast %0 : vector<1x8x32xf32> to vector<8x32xf32>
    %2 = arith.truncf %1 : vector<8x32xf32> to vector<8x32xbf16>
    %c0_2 = arith.constant 0 : index
    %c0_3 = arith.constant 0 : index
    %3 = vector.load %arg2[%c0_2, %c0_3] : memref<32x128xbf16, #tpu.memory_space<vmem>>, vector<32x128xbf16>
    %cst = arith.constant dense<0.000000e+00> : vector<8x128xf32>
    %4 = tpu.matmul %2, %3, %cst {dimension_numbers = #tpu.dot_dimension_numbers<[1], [0], [0], [1], [0, 0, 1, 1], [], []>} : vector<8x32xbf16>, vector<32x128xbf16>, vector<8x128xf32> -> vector<8x128xf32>
    %5 = vector.extract_strided_slice %4 {offsets = [0, 0], sizes = [8, 64], strides = [1, 1]} : vector<8x128xf32> to vector<8x64xf32>
    %6 = vector.extract_strided_slice %4 {offsets = [0, 64], sizes = [8, 64], strides = [1, 1]} : vector<8x128xf32> to vector<8x64xf32>
    %c0_4 = arith.constant 0 : index
    %c0_5 = arith.constant 0 : index
    %7 = vector.load %arg3[%c0_4, %c0_5] : memref<4x64xf32, #tpu.memory_space<vmem>>, vector<4x64xf32>
    %cst_6 = arith.constant 0.000000e+00 : f32
    %8 = vector.broadcast %cst_6 : f32 to vector<3x64xf32>
    %c0_7 = arith.constant 0 : index
    %c0_8 = arith.constant 0 : index
    %9 = vector.load %arg14[%c0_7, %c0_8] : memref<11x64xf32, #tpu.memory_space<vmem>>, vector<3x64xf32>
    tpu.vector_store %arg14[%c0_7, %c0_8], %8 {strides = array<i32>} : memref<11x64xf32, #tpu.memory_space<vmem>>, vector<3x64xf32>,
    %c3 = arith.constant 3 : index
    %c0_9 = arith.constant 0 : index
    %10 = vector.load %arg14[%c3, %c0_9] : memref<11x64xf32, #tpu.memory_space<vmem>>, vector<8x64xf32>
    tpu.vector_store %arg14[%c3, %c0_9], %5 {strides = array<i32>} : memref<11x64xf32, #tpu.memory_space<vmem>>, vector<8x64xf32>,
    %c3_10 = arith.constant 3 : index
    %c0_11 = arith.constant 0 : index
    %11 = vector.load %arg14[%c3_10, %c0_11] : memref<11x64xf32, #tpu.memory_space<vmem>>, vector<8x64xf32>
    %12 = vector.extract_strided_slice %7 {offsets = [3, 0], sizes = [1, 64], strides = [1, 1]} : vector<4x64xf32> to vector<1x64xf32>
    %13 = vector.broadcast %12 : vector<1x64xf32> to vector<8x64xf32>
    %14 = arith.mulf %11, %13 : vector<8x64xf32>
    %c0_12 = arith.constant 0 : index
    %c0_13 = arith.constant 0 : index
    %15 = vector.load %arg14[%c0_12, %c0_13] : memref<11x64xf32, #tpu.memory_space<vmem>>, vector<8x64xf32>
    %16 = vector.extract_strided_slice %7 {offsets = [0, 0], sizes = [1, 64], strides = [1, 1]} : vector<4x64xf32> to vector<1x64xf32>
    %17 = vector.broadcast %16 : vector<1x64xf32> to vector<8x64xf32>
    %18 = arith.mulf %15, %17 : vector<8x64xf32>
    %19 = arith.addf %14, %18 : vector<8x64xf32>
    %c1 = arith.constant 1 : index
    %c0_14 = arith.constant 0 : index
    %20 = vector.load %arg14[%c1, %c0_14] : memref<11x64xf32, #tpu.memory_space<vmem>>, vector<8x64xf32>
    %21 = vector.extract_strided_slice %7 {offsets = [1, 0], sizes = [1, 64], strides = [1, 1]} : vector<4x64xf32> to vector<1x64xf32>
    %22 = vector.broadcast %21 : vector<1x64xf32> to vector<8x64xf32>
    %23 = arith.mulf %20, %22 : vector<8x64xf32>
    %24 = arith.addf %19, %23 : vector<8x64xf32>
    %c2 = arith.constant 2 : index
    %c0_15 = arith.constant 0 : index
    %25 = vector.load %arg14[%c2, %c0_15] : memref<11x64xf32, #tpu.memory_space<vmem>>, vector<8x64xf32>
    %26 = vector.extract_strided_slice %7 {offsets = [2, 0], sizes = [1, 64], strides = [1, 1]} : vector<4x64xf32> to vector<1x64xf32>
    %27 = vector.broadcast %26 : vector<1x64xf32> to vector<8x64xf32>
    %28 = arith.mulf %25, %27 : vector<8x64xf32>
    %29 = arith.addf %24, %28 : vector<8x64xf32>
    %c0_16 = arith.constant 0 : index
    %c0_17 = arith.constant 0 : index
    %30 = vector.load %arg4[%c0_16, %c0_17] : memref<1x64xf32, #tpu.memory_space<vmem>>, vector<1x64xf32>
    %31 = vector.broadcast %30 : vector<1x64xf32> to vector<8x64xf32>
    %32 = arith.addf %29, %31 : vector<8x64xf32>
    %33 = arith.negf %32 : vector<8x64xf32>
    %34 = math.exp %33 : vector<8x64xf32>
    %cst_18 = arith.constant 1.000000e+00 : f32
    %35 = vector.broadcast %cst_18 : f32 to vector<8x64xf32>
    %36 = arith.addf %35, %34 : vector<8x64xf32>
    %37 = arith.divf %35, %36 : vector<8x64xf32>
    %38 = arith.mulf %32, %37 : vector<8x64xf32>
    %39 = arith.truncf %38 : vector<8x64xf32> to vector<8x64xbf16>
    %c0_19 = arith.constant 0 : index
    %c0_20 = arith.constant 0 : index
    %40 = vector.load %arg5[%c0_19, %c0_20] : memref<64x34xbf16, #tpu.memory_space<vmem>>, vector<64x34xbf16>
    %cst_21 = arith.constant dense<0.000000e+00> : vector<8x34xf32>
    %41 = tpu.matmul %39, %40, %cst_21 {dimension_numbers = #tpu.dot_dimension_numbers<[1], [0], [0], [1], [0, 0, 1, 1], [], []>} : vector<8x64xbf16>, vector<64x34xbf16>, vector<8x34xf32> -> vector<8x34xf32>
    %42 = vector.extract_strided_slice %41 {offsets = [0, 0], sizes = [8, 16], strides = [1, 1]} : vector<8x34xf32> to vector<8x16xf32>
    %43 = vector.extract_strided_slice %41 {offsets = [0, 16], sizes = [8, 16], strides = [1, 1]} : vector<8x34xf32> to vector<8x16xf32>
    %44 = vector.extract_strided_slice %41 {offsets = [0, 32], sizes = [8, 2], strides = [1, 1]} : vector<8x34xf32> to vector<8x2xf32>
    %45 = arith.truncf %44 : vector<8x2xf32> to vector<8x2xbf16>
    %c0_22 = arith.constant 0 : index
    %c0_23 = arith.constant 0 : index
    %46 = vector.load %arg6[%c0_22, %c0_23] : memref<2x64xbf16, #tpu.memory_space<vmem>>, vector<2x64xbf16>
    %cst_24 = arith.constant dense<0.000000e+00> : vector<8x64xf32>
    %47 = tpu.matmul %45, %46, %cst_24 {dimension_numbers = #tpu.dot_dimension_numbers<[1], [0], [0], [1], [0, 0, 1, 1], [], []>} : vector<8x2xbf16>, vector<2x64xbf16>, vector<8x64xf32> -> vector<8x64xf32>
    %c0_25 = arith.constant 0 : index
    %c0_26 = arith.constant 0 : index
    %48 = vector.load %arg7[%c0_25, %c0_26] : memref<1x64xf32, #tpu.memory_space<vmem>>, vector<1x64xf32>
    %49 = vector.broadcast %48 : vector<1x64xf32> to vector<8x64xf32>
    %50 = arith.addf %47, %49 : vector<8x64xf32>
    %cst_27 = arith.constant 0.000000e+00 : f32
    %51 = vector.broadcast %cst_27 : f32 to vector<8x64xf32>
    %52 = arith.maximumf %50, %51 : vector<8x64xf32>
    %53 = math.absf %50 : vector<8x64xf32>
    %cst_28 = arith.constant 0.000000e+00 : f32
    %54 = vector.broadcast %cst_28 : f32 to vector<8x64xf32>
    %55 = arith.subf %54, %53 : vector<8x64xf32>
    %56 = math.exp %55 : vector<8x64xf32>
    %cst_29 = arith.constant 1.000000e+00 : f32
    %57 = vector.broadcast %cst_29 : f32 to vector<8x64xf32>
    %58 = arith.addf %57, %56 : vector<8x64xf32>
    %59 = math.log %58 : vector<8x64xf32>
    %60 = arith.addf %52, %59 : vector<8x64xf32>
    %c0_30 = arith.constant 0 : index
    %c0_31 = arith.constant 0 : index
    %61 = vector.load %arg8[%c0_30, %c0_31] : memref<16x64xf32, #tpu.memory_space<vmem>>, vector<16x64xf32>
    %cst_32 = arith.constant 0.000000e+00 : f32
    %62 = vector.broadcast %cst_32 : f32 to vector<16x64xf32>
    %63 = arith.mulf %60, %38 : vector<8x64xf32>
    %64 = vector.shape_cast %60 : vector<8x64xf32> to vector<8x1x64xf32>
    %65 = vector.shape_cast %61 : vector<16x64xf32> to vector<1x16x64xf32>
    %66 = vector.broadcast %64 : vector<8x1x64xf32> to vector<8x16x64xf32>
    %67 = vector.broadcast %65 : vector<1x16x64xf32> to vector<8x16x64xf32>
    %68 = arith.mulf %66, %67 : vector<8x16x64xf32>
    %69 = math.exp %68 : vector<8x16x64xf32>
    %c0_33 = arith.constant 0 : index
    %c0_34 = arith.constant 0 : index
    %c0_35 = arith.constant 0 : index
    %70 = vector.load %arg15[%c0_33, %c0_34, %c0_35] : memref<8x16x64xf32, #tpu.memory_space<vmem>>, vector<8x16x64xf32>
    tpu.vector_store %arg15[%c0_33, %c0_34, %c0_35], %69 {strides = array<i32>} : memref<8x16x64xf32, #tpu.memory_space<vmem>>, vector<8x16x64xf32>,
    %71 = vector.shape_cast %63 : vector<8x64xf32> to vector<8x1x64xf32>
    %72 = vector.shape_cast %42 : vector<8x16xf32> to vector<8x16x1xf32>
    %73 = vector.broadcast %71 : vector<8x1x64xf32> to vector<8x16x64xf32>
    %74 = vector.broadcast %72 : vector<8x16x1xf32> to vector<8x16x64xf32>
    %75 = arith.mulf %73, %74 : vector<8x16x64xf32>
    %c0_36 = arith.constant 0 : index
    %c0_37 = arith.constant 0 : index
    %c0_38 = arith.constant 0 : index
    %76 = vector.load %arg16[%c0_36, %c0_37, %c0_38] : memref<8x16x64xf32, #tpu.memory_space<vmem>>, vector<8x16x64xf32>
    tpu.vector_store %arg16[%c0_36, %c0_37, %c0_38], %75 {strides = array<i32>} : memref<8x16x64xf32, #tpu.memory_space<vmem>>, vector<8x16x64xf32>,
    %c0_i32 = arith.constant 0 : i32
    %c8_i32 = arith.constant 8 : i32
    %77 = arith.addi %c0_i32, %c8_i32 : i32
    %c1_i32 = arith.constant 1 : i32
    %78 = scf.for %arg19 = %c0_i32 to %77 step %c1_i32 iter_args(%arg20 = %62) -> (vector<16x64xf32>)  : i32 {
      %128 = arith.index_cast %arg19 : i32 to index
      %c0_66 = arith.constant 0 : index
      %c0_67 = arith.constant 0 : index
      %129 = vector.load %arg15[%128, %c0_66, %c0_67] : memref<8x16x64xf32, #tpu.memory_space<vmem>>, vector<1x16x64xf32>
      %130 = vector.shape_cast %129 : vector<1x16x64xf32> to vector<16x64xf32>
      %131 = arith.mulf %130, %arg20 : vector<16x64xf32>
      %132 = arith.index_cast %arg19 : i32 to index
      %c0_68 = arith.constant 0 : index
      %c0_69 = arith.constant 0 : index
      %133 = vector.load %arg16[%132, %c0_68, %c0_69] : memref<8x16x64xf32, #tpu.memory_space<vmem>>, vector<1x16x64xf32>
      %134 = vector.shape_cast %133 : vector<1x16x64xf32> to vector<16x64xf32>
      %135 = arith.addf %131, %134 : vector<16x64xf32>
      %136 = arith.index_cast %arg19 : i32 to index
      %c0_70 = arith.constant 0 : index
      %c0_71 = arith.constant 0 : index
      %137 = vector.load %arg17[%136, %c0_70, %c0_71] : memref<8x16x64xf32, #tpu.memory_space<vmem>>, vector<1x16x64xf32>
      %138 = vector.shape_cast %137 : vector<1x16x64xf32> to vector<16x64xf32>
      %139 = vector.shape_cast %135 : vector<16x64xf32> to vector<1x16x64xf32>
      tpu.vector_store %arg17[%136, %c0_70, %c0_71], %139 {strides = array<i32>} : memref<8x16x64xf32, #tpu.memory_space<vmem>>, vector<1x16x64xf32>,
      scf.yield %135 : vector<16x64xf32>
    }
    %c8_i32_39 = arith.constant 8 : i32
    %c0_40 = arith.constant 0 : index
    %c0_41 = arith.constant 0 : index
    %c0_42 = arith.constant 0 : index
    %79 = vector.load %arg17[%c0_40, %c0_41, %c0_42] : memref<8x16x64xf32, #tpu.memory_space<vmem>>, vector<8x16x64xf32>
    %80 = vector.shape_cast %43 : vector<8x16xf32> to vector<8x16x1xf32>
    %81 = vector.broadcast %80 : vector<8x16x1xf32> to vector<8x16x64xf32>
    %82 = arith.mulf %79, %81 : vector<8x16x64xf32>
    %cst_43 = arith.constant dense<0.000000e+00> : vector<8x64xf32>
    %83 = vector.multi_reduction <add>, %82, %cst_43 [1] : vector<8x16x64xf32> to vector<8x64xf32>
    %c0_44 = arith.constant 0 : index
    %c0_45 = arith.constant 0 : index
    %84 = vector.load %arg18[%c0_44, %c0_45] : memref<8x64xf32, #tpu.memory_space<vmem>>, vector<8x64xf32>
    tpu.vector_store %arg18[%c0_44, %c0_45], %83 {strides = array<i32>} : memref<8x64xf32, #tpu.memory_space<vmem>>, vector<8x64xf32>,
    %c0_46 = arith.constant 0 : index
    %c0_47 = arith.constant 0 : index
    %85 = vector.load %arg18[%c0_46, %c0_47] : memref<8x64xf32, #tpu.memory_space<vmem>>, vector<8x64xf32>
    %c0_48 = arith.constant 0 : index
    %c0_49 = arith.constant 0 : index
    %86 = vector.load %arg9[%c0_48, %c0_49] : memref<1x64xf32, #tpu.memory_space<vmem>>, vector<1x64xf32>
    %87 = vector.broadcast %86 : vector<1x64xf32> to vector<8x64xf32>
    %88 = arith.mulf %38, %87 : vector<8x64xf32>
    %89 = arith.addf %85, %88 : vector<8x64xf32>
    %90 = arith.negf %6 : vector<8x64xf32>
    %91 = math.exp %90 : vector<8x64xf32>
    %cst_50 = arith.constant 1.000000e+00 : f32
    %92 = vector.broadcast %cst_50 : f32 to vector<8x64xf32>
    %93 = arith.addf %92, %91 : vector<8x64xf32>
    %94 = arith.divf %92, %93 : vector<8x64xf32>
    %95 = arith.mulf %6, %94 : vector<8x64xf32>
    %96 = arith.mulf %89, %95 : vector<8x64xf32>
    %97 = arith.truncf %96 : vector<8x64xf32> to vector<8x64xbf16>
    %c0_51 = arith.constant 0 : index
    %c0_52 = arith.constant 0 : index
    %98 = vector.load %arg10[%c0_51, %c0_52] : memref<64x32xbf16, #tpu.memory_space<vmem>>, vector<64x32xbf16>
    %cst_53 = arith.constant dense<0.000000e+00> : vector<8x32xf32>
    %99 = tpu.matmul %97, %98, %cst_53 {dimension_numbers = #tpu.dot_dimension_numbers<[1], [0], [0], [1], [0, 0, 1, 1], [], []>} : vector<8x64xbf16>, vector<64x32xbf16>, vector<8x32xf32> -> vector<8x32xf32>
    %100 = arith.addf %1, %99 : vector<8x32xf32>
    %cst_54 = arith.constant dense<0.000000e+00> : vector<8xf32>
    %101 = vector.multi_reduction <add>, %100, %cst_54 [1] : vector<8x32xf32> to vector<8xf32>
    %102 = vector.shape_cast %101 : vector<8xf32> to vector<8x1xf32>
    %cst_55 = arith.constant 3.200000e+01 : f32
    %103 = vector.broadcast %cst_55 : f32 to vector<8x1xf32>
    %104 = arith.divf %102, %103 : vector<8x1xf32>
    %105 = vector.broadcast %104 : vector<8x1xf32> to vector<8x32xf32>
    %106 = arith.subf %100, %105 : vector<8x32xf32>
    %107 = arith.mulf %106, %106 : vector<8x32xf32>
    %cst_56 = arith.constant dense<0.000000e+00> : vector<8xf32>
    %108 = vector.multi_reduction <add>, %107, %cst_56 [1] : vector<8x32xf32> to vector<8xf32>
    %109 = vector.shape_cast %108 : vector<8xf32> to vector<8x1xf32>
    %cst_57 = arith.constant 3.200000e+01 : f32
    %110 = vector.broadcast %cst_57 : f32 to vector<8x1xf32>
    %111 = arith.divf %109, %110 : vector<8x1xf32>
    %112 = vector.broadcast %104 : vector<8x1xf32> to vector<8x32xf32>
    %113 = arith.subf %100, %112 : vector<8x32xf32>
    %cst_58 = arith.constant 9.99999974E-6 : f32
    %114 = vector.broadcast %cst_58 : f32 to vector<8x1xf32>
    %115 = arith.addf %111, %114 : vector<8x1xf32>
    %116 = math.rsqrt %115 : vector<8x1xf32>
    %117 = vector.broadcast %116 : vector<8x1xf32> to vector<8x32xf32>
    %118 = arith.mulf %113, %117 : vector<8x32xf32>
    %c0_59 = arith.constant 0 : index
    %c0_60 = arith.constant 0 : index
    %119 = vector.load %arg11[%c0_59, %c0_60] : memref<1x32xf32, #tpu.memory_space<vmem>>, vector<1x32xf32>
    %120 = vector.broadcast %119 : vector<1x32xf32> to vector<8x32xf32>
    %121 = arith.mulf %118, %120 : vector<8x32xf32>
    %c0_61 = arith.constant 0 : index
    %c0_62 = arith.constant 0 : index
    %122 = vector.load %arg12[%c0_61, %c0_62] : memref<1x32xf32, #tpu.memory_space<vmem>>, vector<1x32xf32>
    %123 = vector.broadcast %122 : vector<1x32xf32> to vector<8x32xf32>
    %124 = arith.addf %121, %123 : vector<8x32xf32>
    %c0_63 = arith.constant 0 : index
    %c0_64 = arith.constant 0 : index
    %c0_65 = arith.constant 0 : index
    %125 = vector.load %arg13[%c0_63, %c0_64, %c0_65] : memref<1x8x32xf32, #tpu.memory_space<vmem>>, vector<1x8x32xf32>
    %126 = vector.shape_cast %125 : vector<1x8x32xf32> to vector<8x32xf32>
    %127 = vector.shape_cast %124 : vector<8x32xf32> to vector<1x8x32xf32>
    tpu.vector_store %arg13[%c0_63, %c0_64, %c0_65], %127 {strides = array<i32>} : memref<1x8x32xf32, #tpu.memory_space<vmem>>, vector<1x8x32xf32>,
    return
  }
  func.func @transform_0(%arg0: i32) -> (i32, i32, i32) {
    %c0_i32 = arith.constant 0 : i32
    %c0_i32_0 = arith.constant 0 : i32
    %c0_i32_1 = arith.constant 0 : i32
    return %arg0, %c0_i32, %c0_i32_0 : i32, i32, i32
  }
  func.func @transform_1(%arg0: i32) -> (i32, i32) {
    %c0_i32 = arith.constant 0 : i32
    %c0_i32_0 = arith.constant 0 : i32
    %c0_i32_1 = arith.constant 0 : i32
    return %c0_i32, %c0_i32_0 : i32, i32
  }
  func.func @transform_2(%arg0: i32) -> (i32, i32) {
    %c0_i32 = arith.constant 0 : i32
    %c0_i32_0 = arith.constant 0 : i32
    %c0_i32_1 = arith.constant 0 : i32
    return %c0_i32, %c0_i32_0 : i32, i32
  }
  func.func @transform_3(%arg0: i32) -> (i32, i32) {
    %c0_i32 = arith.constant 0 : i32
    %c0_i32_0 = arith.constant 0 : i32
    %c0_i32_1 = arith.constant 0 : i32
    return %c0_i32, %c0_i32_0 : i32, i32
  }
  func.func @transform_4(%arg0: i32) -> (i32, i32) {
    %c0_i32 = arith.constant 0 : i32
    %c0_i32_0 = arith.constant 0 : i32
    %c0_i32_1 = arith.constant 0 : i32
    return %c0_i32, %c0_i32_0 : i32, i32
  }
  func.func @transform_5(%arg0: i32) -> (i32, i32) {
    %c0_i32 = arith.constant 0 : i32
    %c0_i32_0 = arith.constant 0 : i32
    %c0_i32_1 = arith.constant 0 : i32
    return %c0_i32, %c0_i32_0 : i32, i32
  }
  func.func @transform_6(%arg0: i32) -> (i32, i32) {
    %c0_i32 = arith.constant 0 : i32
    %c0_i32_0 = arith.constant 0 : i32
    %c0_i32_1 = arith.constant 0 : i32
    return %c0_i32, %c0_i32_0 : i32, i32
  }
  func.func @transform_7(%arg0: i32) -> (i32, i32) {
    %c0_i32 = arith.constant 0 : i32
    %c0_i32_0 = arith.constant 0 : i32
    %c0_i32_1 = arith.constant 0 : i32
    return %c0_i32, %c0_i32_0 : i32, i32
  }
  func.func @transform_8(%arg0: i32) -> (i32, i32) {
    %c0_i32 = arith.constant 0 : i32
    %c0_i32_0 = arith.constant 0 : i32
    %c0_i32_1 = arith.constant 0 : i32
    return %c0_i32, %c0_i32_0 : i32, i32
  }
  func.func @transform_9(%arg0: i32) -> (i32, i32) {
    %c0_i32 = arith.constant 0 : i32
    %c0_i32_0 = arith.constant 0 : i32
    %c0_i32_1 = arith.constant 0 : i32
    return %c0_i32, %c0_i32_0 : i32, i32
  }
  func.func @transform_10(%arg0: i32) -> (i32, i32) {
    %c0_i32 = arith.constant 0 : i32
    %c0_i32_0 = arith.constant 0 : i32
    %c0_i32_1 = arith.constant 0 : i32
    return %c0_i32, %c0_i32_0 : i32, i32
  }
  func.func @transform_11(%arg0: i32) -> (i32, i32) {
    %c0_i32 = arith.constant 0 : i32
    %c0_i32_0 = arith.constant 0 : i32
    %c0_i32_1 = arith.constant 0 : i32
    return %c0_i32, %c0_i32_0 : i32, i32
  }
  func.func @transform_12(%arg0: i32) -> (i32, i32, i32) {
    %c0_i32 = arith.constant 0 : i32
    %c0_i32_0 = arith.constant 0 : i32
    %c0_i32_1 = arith.constant 0 : i32
    return %arg0, %c0_i32, %c0_i32_0 : i32, i32, i32
  }
}

</mosaic_0001>

<bundles_post_ra>
// kernel: tpu_custom_call.1
= control target key start
LH: loop header
LB: loop body
LE: loop exit
PB: predicated region body
PF: predicated region fallthrough
CT: control target
= control target key end

     0   :  { %s1985_s0 = inlined_call_operand.vmem [shape: f32[2,8,32], index: 0, kind: input, shape index: {}]   ;;  %s1986_s1 = inlined_call_operand.vmem [shape: bf16[32,128], index: 1, kind: input, shape index: {}]   ;;  %s1987_s2 = inlined_call_operand.vmem [shape: f32[4,64], index: 2, kind: input, shape index: {}]   ;;  %s1988_s3 = inlined_call_operand.vmem [shape: f32[1,64], index: 3, kind: input, shape index: {}]   ;;  %s1989_s4 = inlined_call_operand.vmem [shape: bf16[64,34], index: 4, kind: input, shape index: {}]   ;;  %s1990_s5 = inlined_call_operand.vmem [shape: bf16[2,64], index: 5, kind: input, shape index: {}]   ;;  %s1991_s6 = inlined_call_operand.vmem [shape: f32[1,64], index: 6, kind: input, shape index: {}]   ;;  %s1992_s7 = inlined_call_operand.vmem [shape: f32[16,64], index: 7, kind: input, shape index: {}]   ;;  %s1993_s8 = inlined_call_operand.vmem [shape: f32[1,64], index: 8, kind: input, shape index: {}]   ;;  %s1994_s9 = inlined_call_operand.vmem [shape: bf16[64,32], index: 9, kind: input, shape index: {}]   ;;  %s1995_s10 = inlined_call_operand.vmem [shape: f32[1,32], index: 10, kind: input, shape index: {}]   ;;  %s1996_s11 = inlined_call_operand.vmem [shape: f32[1,32], index: 11, kind: input, shape index: {}]   ;;  %s1997_s12 = inlined_call_operand.hbm [shape: f32[2,8,32], index: 12, kind: output, shape index: {}]  }
   0x1   :  { %2000 = sst [smem:[#allocation12_spill]] %s1985_s0 }
   0x2   :  { %17 = vsyncpa [#allocation8], 0 }
   0x3   :  { %19 = vsyncpa [#allocation8 + $0x1], 0  ;;  %s1657_s21 = smov 0   ;;  %s1659_s22 = smov 0  }
   0x4   :  { %s1661_s23 = smov 0   ;;  %s1663_s24 = smov 0  }
   0x5 LB: > { %2001 = sst [smem:[#allocation10_spill]] %s1570_s23  ;;  %s1678_s25 = sadd.s32 4294967295, %s1574_s24   ;;  %s1574_s24 = sphi %s1663_s24, %s2011_s24   ;;  %s1570_s23 = sphi %s1661_s23, %s2008_s23   ;;  %s1566_s22 = sphi %s1659_s22, %s2010_s22   ;;  %s1562_s21 = sphi %s1657_s21, %s2009_s21  }
   0x6   : > { %s1289_s26 = sadd.s32 4294967294, %s1574_s24   ;;  %s1682_s27 = sadd.s32 1, %s1574_s24  }
   0x7   : > { %s289_s28 = sadd.s32 1, %s1570_s23  ;;  %s286_s29 = ssub.s32 %s1574_s24, %s1682_s27 }
   0x8   : > { %p299_p0 = scmp.ne.s32.totalorder %s1570_s23, %s1566_s22  ;;  %p287_p1 = scmp.eq.s32.totalorder %s286_s29, 0 }
   0x9   : > { %p300_p2 = scmp.eq.s32.totalorder %s1678_s25, 1  ;;  %p305_p3 = scmp.ne.s32.totalorder %s1566_s22, %s1562_s21 }
   0xa   : > { %p306_p4 = scmp.eq.s32.totalorder %s1289_s26, 1  ;;  %p1292_p7 = scmp.ge.s32.totalorder %s1574_s24, 1 }
   0xb   : > { %s1693_s30 = scalar_select %p287_p1, %s1570_s23, %s289_s28  }
   0xc   : > { %p1695_p5 = por %p300_p2, %p299_p0  ;;  %p1699_p6 = por %p306_p4, %p305_p3 }
   0xd   : > { %2002 = sst [smem:[#allocation11_spill]] %s1693_s30  ;;  %p364_p8 = scmp.lt.s32.totalorder %s1574_s24, 3 }
   0xf   : > { %p365_p9 = pnand %p1292_p7, %p364_p8 }
  0x10   : > { %s1999_s15 = sand.u32 (!%p365_p9), 1, %s1566_s22   ;;  %p405_p10 = scmp.lt.s32.totalorder (!%p365_p9), %s1678_s25, 1 }
  0x11   : > { %368 = sbr.rel (%p365_p9) target bundleno = 1294 (0x50e), region = 68  ;;  %s1712_s18 = sshll.u32 (!%p365_p9), %s1999_s15, 3 }
  0x12   : > { %s2005_s0 = sld [smem:[#allocation12_spill]] (!%p365_p9)  ;;  %s1589_s20 = smov (!%p365_p9), 96  }
  0x16   : > { %v1347_v0 = vld [vmem:[%s1986_s1 + $0x8] sm:$0xff]  ;;  %v1346_v1 = vld [vmem:[%s1986_s1] sm:$0xff]  ;;  %s406_s26 = scalar_select %p405_p10, %s1678_s25, 1  ;;  %vm428_vm0 = vcmask 261120   ;;  %vm446_vm1 = vcmask 518144   ;;  %v1588_v4 = vmov 0.0   ;;  %v678_v30 = vlaneseq }
  0x17   : > { %438 = vmatpush.bf16.msra.mxu0 %v1347_v0  ;;  %447 = vst.msk [vmem:[#allocation2] sm:$0x7] %vm446_vm1, %v1588_v4  ;;  %v1351_v5 = vld [vmem:[%s1989_s4 + $0x18] sm:$0xff]  ;;  %v1350_v6 = vld [vmem:[%s1989_s4 + $0x10] sm:$0xff]  ;;  %v1349_v7 = vld [vmem:[%s1989_s4 + $0x8] sm:$0xff]  ;;  %vm448_vm2 = vcmask 523264  }
  0x18   : > { %s1294_s28 = sshll.u32 %s406_s26, 3  ;;  %530 = vmatpush.bf16.msra.mxu1 %v1351_v5  ;;  %v1348_v8 = vld [vmem:[%s1989_s4] sm:$0xff]  ;;  %v1748_v31 = vshrl.u32 %v678_v30, 7  ;;  %vm552_vm7 = vcmask 1040384   ;;  %vm548_vm8 = vcmask 15360  }
  0x19   : > { %s408_s23 = scalar_lea.vmem %s2005_s0, %s1294_s28  ;;  %v445_v10 = vld [vmem:[%s1987_s2] sm:$0xf] }
  0x1a   : > { %v1721_v2 = vld [vmem:[%s408_s23] sm:$0xff]  ;;  %v451_v11 = vperm.slane %v445_v10, 3  ;;  %v454_v12 = vperm.slane %v445_v10, 0  ;;  %v458_v13 = vperm.slane %v445_v10, 1  ;;  %v462_v20 = vperm.slane %v445_v10, 2  ;;  %1423 = vset.pattern.permute.xlu0 %v1748_v31  ;;  %s1584_s23 = smov 0  }
  0x1b   : > { %439 = vmatpush.bf16.msra.mxu0 %v1346_v1  ;;  %v411_v3 = vpack.c.bf16 %v1721_v2, %v1721_v2  ;;  %v1436_v26 = vld [vmem:[%s1988_s3] ss:$0 sm:$0xff]  ;;  %v686_v32 = vadd.s32 8, %v1748_v31 }
  0x1c   : > { %531 = vmatpush.bf16.msra.mxu1 %v1350_v6  ;;  %v540_v58 = vld [vmem:[%s1990_s5] sm:$0x1] }
  0x1d   : > { %1426 = vset.pattern.permute.xlu2 %v686_v32  ;;  %1424 = vset.pattern.permute.xlu1 %v686_v32  ;;  %v554_v59 = vsel %vm552_vm7, %v540_v58, 0  ;;  %v1437_v61 = vld [vmem:[%s1991_s6] ss:$0 sm:$0xff] }
  0x1e   : > { %1303 = vmatmul.msk.bf16.vlgmr.msra.gmra.mxu0 %vm428_vm0, %v411_v3  ;;  %563 = vmatpush.bf16.msra.mxu2 %v554_v59 }
  0x20   : > { %532 = vmatpush.bf16.msra.mxu1 %v1349_v7 }
  0x24   : > { %533 = vmatpush.bf16.msra.mxu1 %v1348_v8 }
  0x9b   : > { %v1738_v9 = vpop.f32.mrf.mxu0 }
  0x9c   : > { %449 = vst.msk [vmem:[#allocation2 + $0x3] sm:$0xff] %vm448_vm2, %v1738_v9 }
  0xa3   : > { %v443_v14 = vpop.f32.mrf.mxu0  ;;  %v450_v15 = vld [vmem:[#allocation2 + $0x3] sm:$0xff] }
  0xa4   : > { %v453_v16 = vld [vmem:[#allocation2] sm:$0xff]  ;;  %v452_v18 = vmul.f32 %v451_v11, %v450_v15 }
  0xa5   : > { %v457_v17 = vld [vmem:[#allocation2 + $0x1] sm:$0xff]  ;;  %v455_v19 = vmul.f32 %v454_v12, %v453_v16 }
  0xa6   : > { %v461_v21 = vld [vmem:[#allocation2 + $0x2] sm:$0xff]  ;;  %v459_v23 = vmul.f32 %v458_v13, %v457_v17 }
  0xa7   : > { %v456_v22 = vadd.f32 %v455_v19, %v452_v18  ;;  %v463_v25 = vmul.f32 %v462_v20, %v461_v21  ;;  %v578_v18 = vld [vmem:[%s1992_s7] sm:$0xff]  ;;  %v579_v19 = vld [vmem:[%s1992_s7 + $0x8] sm:$0xff] }
  0xa9   : > { %v460_v24 = vadd.f32 %v459_v23, %v456_v22 }
  0xab   : > { %v464_v27 = vadd.f32 %v463_v25, %v460_v24 }
  0xad   : > { %v469_v28 = vadd.f32 %v1436_v26, %v464_v27 }
  0xaf   : > { %v1304_v29 = vmul.f32 -1.442695, %v469_v28 }
  0xb1   : > { %1438 = vpow2.f32 %v1304_v29 }
  0xb7   : > { %v1439_v33 = vpop.eup %1438 }
  0xb8   : > { %v473_v34 = vadd.f32 1.0, %v1439_v33 }
  0xba   : > { %1440 = vrcp.f32 %v473_v34  ;;  %v485_v38 = vand.u32 2147483648, %v473_v34  ;;  %v483_v40 = vand.u32 2147483647, %v473_v34  ;;  %vm479_vm4 = vweird.f32 %v473_v34 }
  0xbc   : > { %v486_v42 = vor.u32 1.1754944e-38, %v485_v38  ;;  %vm484_vm6 = vcmp.eq.f32.partialorder %v483_v40, 8.507059e+37 }
  0xc0   : > { %v1441_v35 = vpop.eup %1440 }
  0xc1   : > { %v475_v36 = vmul.f32 %v1441_v35, %v473_v34  ;;  %vm480_vm3 = vweird.f32 %v1441_v35 }
  0xc2   : > { %vm481_vm5 = vmor %vm479_vm4, %vm480_vm3 }
  0xc3   : > { %v476_v37 = vsub.f32 1.0, %v475_v36 }
  0xc5   : > { %v477_v39 = vmul.f32 %v1441_v35, %v476_v37 }
  0xc7   : > { %v478_v41 = vadd.f32 %v1441_v35, %v477_v39 }
  0xc9   : > { %v482_v43 = vsel %vm481_vm5, %v1441_v35, %v478_v41 }
  0xca   : > { %v487_v44 = vsel %vm484_vm6, %v486_v42, %v482_v43 }
  0xcb   : > { %v1752_v45 = vmul.f32 %v487_v44, %v469_v28 }
  0xcd   : > { %v490_v46 = vpack.c.bf16 %v1752_v45, %v1752_v45 }
  0xcf   : > { %1321 = vmatmul.msk.bf16.vlgmr.msra.gmra.mxu1 %vm448_vm2, %v490_v46 }
 0x14c   : > { %v535_v47 = vpop.f32.mrf.mxu1 }
 0x14d   : > { %v1757_v48 = vperm.slane %v535_v47, 1  ;;  %v1759_v49 = vperm.slane %v535_v47, 0  ;;  %v539_v50 = vpack.c.bf16 %v535_v47, %v535_v47  ;;  %v1766_v52 = vperm.slane %v535_v47, 2 }
 0x14e   : > { %v1770_v53 = vperm.slane %v535_v47, 3  ;;  %v1776_v54 = vperm.slane %v535_v47, 4  ;;  %v1778_v55 = vperm.slane %v535_v47, 6  ;;  %v1783_v56 = vperm.slane %v535_v47, 5 }
 0x14f   : > { %701 = vperm.xlu2 %1426, %v1757_v48   ;;  %688 = vperm.xlu1 %1424, %v1759_v49   ;;  %v1789_v57 = vperm.slane %v535_v47, 7 }
 0x150   : > { %546 = vrot.lane.b32.xlu0 %v539_v50, %s1589_s20  ;;  %s404_s20 = scalar_lea.vmem [#allocation7], %s1712_s18 }
 0x154   : > { %v537_v51 = vpop.f32.mrf.mxu1 }
 0x157   : > { %1427 = vset.pattern.permute.xlu2 %v1748_v31  ;;  %1425 = vset.pattern.permute.xlu1 %v1748_v31 }
 0x158   : > { %682 = vperm.xlu0 %1423, %v1759_v49  }
 0x15f   : > { %708 = vperm.xlu2 %1427, %v1766_v52   ;;  %695 = vperm.xlu1 %1425, %v1757_v48  }
 0x160   : > { %1429 = vset.pattern.permute.xlu0 %v686_v32 }
 0x167   : > { %721 = vperm.xlu2 %1427, %v1770_v53   ;;  %1428 = vset.pattern.permute.xlu1 %v686_v32 }
 0x168   : > { %727 = vperm.xlu0 %1429, %v1770_v53  }
 0x16f   : > { %1431 = vset.pattern.permute.xlu2 %v686_v32  ;;  %714 = vperm.xlu1 %1428, %v1766_v52  }
 0x170   : > { %1432 = vset.pattern.permute.xlu0 %v1748_v31 }
 0x177   : > { %740 = vperm.xlu2 %1431, %v1776_v54   ;;  %1430 = vset.pattern.permute.xlu1 %v1748_v31 }
 0x178   : > { %760 = vperm.xlu0 %1432, %v1778_v55  }
 0x17f   : > { %753 = vperm.xlu2 %1431, %v1783_v56   ;;  %734 = vperm.xlu1 %1430, %v1776_v54  }
 0x180   : > { %1435 = vset.pattern.permute.xlu0 %v686_v32 }
 0x187   : > { %1434 = vset.pattern.permute.xlu2 %v1748_v31  ;;  %747 = vperm.xlu1 %1430, %v1783_v56  }
 0x18f   : > { %773 = vperm.xlu2 %1434, %v1789_v57   ;;  %1433 = vset.pattern.permute.xlu1 %v686_v32 }
 0x197   : > { %766 = vperm.xlu1 %1433, %v1778_v55  }
 0x19f   : > { %779 = vperm.xlu1 %1433, %v1789_v57  }
 0x1a9   : > { %v1802_v12 = vpop.permute.xlu2 %701 }
 0x1b9   : > { %v1820_v30 = vpop.permute.xlu2 %708 }
 0x1c1   : > { %v1800_v7 = vpop.permute.xlu1 %688 }
 0x1c2   : > { %v547_v60 = vpop.permute.xlu0 %546 }
 0x1c3   : > { %1322 = vmatmul.msk.bf16.vlgmr.msra.gmra.mxu2 %vm548_vm8, %v547_v60 }
 0x1d1   : > { %v1806_v14 = vpop.permute.xlu1 %695 }
 0x1e1   : > { %v1823_v35 = vpop.permute.xlu1 %714 }
 0x246   : > { %v565_v62 = vpop.f32.mrf.mxu2 }
 0x247   : > { %v566_v63 = vadd.f32 %v1437_v61, %v565_v62 }
 0x249   : > { %v570_v0 = vand.u32 2147483647, %v566_v63  ;;  %v569_v10 = vmax.f32 %v566_v63, 0.0 }
 0x24b   : > { %v571_v1 = vsub.f32 0.0, %v570_v0 }
 0x24d   : > { %v572_v3 = vmul.f32 1.442695, %v571_v1 }
 0x24e   : > { %v567_v4 = vpop.f32.mrf.mxu2 }
 0x24f   : > { %1442 = vpow2.f32 %v572_v3  ;;  %v1826_v3 = vpop.permute.xlu1 %734 }
 0x255   : > { %v1443_v5 = vpop.eup %1442 }
 0x256   : > { %v574_v6 = vadd.f32 1.0, %v1443_v5 }
 0x258   : > { %1444 = vlog2.f32 %v574_v6 }
 0x25e   : > { %v1445_v8 = vpop.eup %1444 }
 0x25f   : > { %v576_v11 = vmul.f32 0.6931472, %v1445_v8  ;;  %v1828_v8 = vpop.permute.xlu2 %721 }
 0x261   : > { %v1804_v13 = vadd.f32 %v576_v11, %v569_v10 }
 0x263   : > { %v582_v15 = vrot.slane %v1804_v13, 1  ;;  %v583_v16 = vrot.slane %v1804_v13, 2  ;;  %v584_v17 = vrot.slane %v1804_v13, 3  ;;  %v585_v20 = vrot.slane %v1804_v13, 4 }
 0x264   : > { %v589_v21 = vperm.slane %v1804_v13, 0  ;;  %v586_v24 = vrot.slane %v1804_v13, 5  ;;  %v587_v32 = vrot.slane %v1804_v13, 6  ;;  %v588_v36 = vrot.slane %v1804_v13, 7 }
 0x265   : > { %v590_v22 = vperm.slane %v582_v15, 0  ;;  %v591_v23 = vperm.slane %v583_v16, 0  ;;  %v592_v25 = vperm.slane %v584_v17, 0  ;;  %v593_v33 = vperm.slane %v585_v20, 0 }
 0x266   : > { %v605_v26 = vmul.f32 %v589_v21, %v578_v18  ;;  %v606_v27 = vmul.f32 %v589_v21, %v579_v19  ;;  %v594_v37 = vperm.slane %v586_v24, 0  ;;  %v595_v46 = vperm.slane %v587_v32, 0  ;;  %v683_v32 = vpop.permute.xlu0 %682 }
 0x267   : > { %v607_v28 = vmul.f32 %v590_v22, %v578_v18  ;;  %v608_v29 = vmul.f32 %v590_v22, %v579_v19  ;;  %v609_v34 = vmul.f32 %v591_v23, %v578_v18  ;;  %v610_v38 = vmul.f32 %v591_v23, %v579_v19 }
 0x268   : > { %v611_v39 = vmul.f32 %v592_v25, %v578_v18  ;;  %v621_v40 = vmul.f32 1.442695, %v605_v26  ;;  %v623_v41 = vmul.f32 1.442695, %v606_v27  ;;  %v612_v43 = vmul.f32 %v592_v25, %v579_v19 }
 0x269   : > { %v625_v42 = vmul.f32 1.442695, %v607_v28  ;;  %v627_v44 = vmul.f32 1.442695, %v608_v29  ;;  %v613_v47 = vmul.f32 %v593_v33, %v578_v18  ;;  %v629_v50 = vmul.f32 1.442695, %v609_v34 }
 0x26a   : > { %1446 = vpow2.f32 %v621_v40  ;;  %v614_v51 = vmul.f32 %v593_v33, %v579_v19  ;;  %v631_v58 = vmul.f32 1.442695, %v610_v38  ;;  %v596_v59 = vperm.slane %v588_v36, 0  ;;  %v741_v33 = vpop.permute.xlu2 %740  ;;  %v748_v36 = vpop.permute.xlu1 %747 }
 0x26b   : > { %1448 = vpow2.f32 %v623_v41  ;;  %v615_v60 = vmul.f32 %v594_v37, %v578_v18  ;;  %v633_v61 = vmul.f32 1.442695, %v611_v39  ;;  %v616_v62 = vmul.f32 %v594_v37, %v579_v19 }
 0x26c   : > { %1450 = vpow2.f32 %v625_v42  ;;  %v635_v63 = vmul.f32 1.442695, %v612_v43  ;;  %v617_v0 = vmul.f32 %v595_v46, %v578_v18  ;;  %v637_v1 = vmul.f32 1.442695, %v613_v47 }
 0x26d   : > { %1452 = vpow2.f32 %v627_v44  ;;  %v618_v4 = vmul.f32 %v595_v46, %v579_v19  ;;  %v639_v5 = vmul.f32 1.442695, %v614_v51  ;;  %v619_v10 = vmul.f32 %v596_v59, %v578_v18 }
 0x26e   : > { %1454 = vpow2.f32 %v629_v50  ;;  %v641_v11 = vmul.f32 1.442695, %v615_v60  ;;  %v620_v16 = vmul.f32 %v596_v59, %v579_v19  ;;  %v643_v17 = vmul.f32 1.442695, %v616_v62 }
 0x26f   : > { %1456 = vpow2.f32 %v631_v58  ;;  %v645_v21 = vmul.f32 1.442695, %v617_v0  ;;  %v1834_v23 = vmul.f32 %v1804_v13, %v1752_v45  ;;  %v647_v18 = vmul.f32 1.442695, %v618_v4 }
 0x270   : > { %v1447_v6 = vpop.eup %1446  ;;  %1458 = vpow2.f32 %v633_v61  ;;  %v649_v19 = vmul.f32 1.442695, %v619_v10  ;;  %v651_v26 = vmul.f32 1.442695, %v620_v16 }
 0x271   : > { %v1449_v15 = vpop.eup %1448  ;;  %1460 = vpow2.f32 %v635_v63  ;;  %653 = vst.msk [vmem:[#allocation3] sm:$0xff] %vm448_vm2, %v1447_v6  ;;  %v670_v28 = vrot.slane %v1834_v23, 1  ;;  %v671_v37 = vrot.slane %v1834_v23, 2  ;;  %v781_v38 = vperm.slane %v1834_v23, 0  ;;  %v728_v63 = vpop.permute.xlu0 %727 }
 0x272   : > { %v1451_v20 = vpop.eup %1450  ;;  %1462 = vpow2.f32 %v637_v1  ;;  %654 = vst.msk [vmem:[#allocation3 + $0x8] sm:$0xff] %vm448_vm2, %v1449_v15  ;;  %v672_v41 = vrot.slane %v1834_v23, 3  ;;  %v673_v46 = vrot.slane %v1834_v23, 4  ;;  %v674_v60 = vrot.slane %v1834_v23, 5  ;;  %v767_v1 = vpop.permute.xlu1 %766 }
 0x273   : > { %v1453_v22 = vpop.eup %1452  ;;  %1464 = vpow2.f32 %v639_v5  ;;  %655 = vst.msk [vmem:[#allocation3 + $0x10] sm:$0xff] %vm448_vm2, %v1451_v20  ;;  %v782_v42 = vperm.slane %v670_v28, 0  ;;  %v783_v47 = vperm.slane %v671_v37, 0  ;;  %v797_v50 = vmul.f32 %v781_v38, %v683_v32 }
 0x274   : > { %v1455_v24 = vpop.eup %1454  ;;  %1466 = vpow2.f32 %v641_v11  ;;  %656 = vst.msk [vmem:[#allocation3 + $0x18] sm:$0xff] %vm448_vm2, %v1453_v22  ;;  %v798_v58 = vmul.f32 %v781_v38, %v1800_v7  ;;  %v784_v61 = vperm.slane %v672_v41, 0  ;;  %v675_v4 = vrot.slane %v1834_v23, 6  ;;  %v754_v7 = vpop.permute.xlu2 %753 }
 0x275   : > { %v1457_v25 = vpop.eup %1456  ;;  %1468 = vpow2.f32 %v643_v17  ;;  %657 = vst.msk [vmem:[#allocation3 + $0x20] sm:$0xff] %vm448_vm2, %v1455_v24  ;;  %v799_v62 = vmul.f32 %v782_v42, %v1806_v14  ;;  %v800_v0 = vmul.f32 %v782_v42, %v1802_v12  ;;  %v785_v5 = vperm.slane %v673_v46, 0 }
 0x276   : > { %v1459_v27 = vpop.eup %1458  ;;  %1470 = vpow2.f32 %v645_v21  ;;  %658 = vst.msk [vmem:[#allocation3 + $0x28] sm:$0xff] %vm448_vm2, %v1457_v25  ;;  %v801_v6 = vmul.f32 %v783_v47, %v1820_v30  ;;  %v802_v10 = vmul.f32 %v783_v47, %v1823_v35  ;;  %v676_v14 = vrot.slane %v1834_v23, 7 }
 0x277   : > { %v1461_v13 = vpop.eup %1460  ;;  %1472 = vpow2.f32 %v647_v18  ;;  %659 = vst.msk [vmem:[#allocation3 + $0x30] sm:$0xff] %vm448_vm2, %v1459_v27  ;;  %v786_v11 = vperm.slane %v674_v60, 0  ;;  %v803_v15 = vmul.f32 %v784_v61, %v1828_v8  ;;  %v804_v12 = vmul.f32 %v784_v61, %v728_v63 }
 0x278   : > { %v1463_v29 = vpop.eup %1462  ;;  %1474 = vpow2.f32 %v649_v19  ;;  %660 = vst.msk [vmem:[#allocation3 + $0x38] sm:$0xff] %vm448_vm2, %v1461_v13  ;;  %v787_v16 = vperm.slane %v675_v4, 0  ;;  %v805_v30 = vmul.f32 %v785_v5, %v1826_v3  ;;  %v806_v17 = vmul.f32 %v785_v5, %v741_v33 }
 0x279   : > { %v1465_v34 = vpop.eup %1464  ;;  %1476 = vpow2.f32 %v651_v26  ;;  %661 = vst.msk [vmem:[#allocation3 + $0x40] sm:$0xff] %vm448_vm2, %v1463_v29  ;;  %v788_v35 = vperm.slane %v676_v14, 0  ;;  %v807_v20 = vmul.f32 %v786_v11, %v748_v36  ;;  %v761_v21 = vpop.permute.xlu0 %760  ;;  %v808_v22 = vmul.f32 %v786_v11, %v754_v7 }
 0x27a   : > { %v1467_v39 = vpop.eup %1466  ;;  %662 = vst.msk [vmem:[#allocation3 + $0x48] sm:$0xff] %vm448_vm2, %v1465_v34  ;;  %v809_v8 = vmul.f32 %v787_v16, %v761_v21  ;;  %v810_v18 = vmul.f32 %v787_v16, %v767_v1  ;;  %v780_v3 = vpop.permute.xlu1 %779  ;;  %v1576_v25 = vmov 0.0   ;;  %v1580_v26 = vmov 0.0  }
 0x27b   : > { %v1469_v40 = vpop.eup %1468  ;;  %663 = vst.msk [vmem:[#allocation3 + $0x50] sm:$0xff] %vm448_vm2, %v1467_v39  ;;  %v812_v19 = vmul.f32 %v788_v35, %v780_v3 }
 0x27c   : > { %v1471_v43 = vpop.eup %1470  ;;  %664 = vst.msk [vmem:[#allocation3 + $0x58] sm:$0xff] %vm448_vm2, %v1469_v40  ;;  %v774_v23 = vpop.permute.xlu2 %773 }
 0x27d   : > { %v1473_v44 = vpop.eup %1472  ;;  %665 = vst.msk [vmem:[#allocation3 + $0x60] sm:$0xff] %vm448_vm2, %v1471_v43  ;;  %v811_v24 = vmul.f32 %v788_v35, %v774_v23 }
 0x27e   : > { %v1475_v51 = vpop.eup %1474  ;;  %666 = vst.msk [vmem:[#allocation3 + $0x68] sm:$0xff] %vm448_vm2, %v1473_v44 }
 0x27f   : > { %v1477_v59 = vpop.eup %1476  ;;  %667 = vst.msk [vmem:[#allocation3 + $0x70] sm:$0xff] %vm448_vm2, %v1475_v51 }
 0x280   : > { %668 = vst.msk [vmem:[#allocation3 + $0x78] sm:$0xff] %vm448_vm2, %v1477_v59 }
 0x281   : > { %813 = vst.msk [vmem:[#allocation4] sm:$0xff] %vm448_vm2, %v797_v50 }
 0x282   : > { %814 = vst.msk [vmem:[#allocation4 + $0x8] sm:$0xff] %vm448_vm2, %v798_v58 }
 0x283   : > { %815 = vst.msk [vmem:[#allocation4 + $0x10] sm:$0xff] %vm448_vm2, %v799_v62 }
 0x284   : > { %816 = vst.msk [vmem:[#allocation4 + $0x18] sm:$0xff] %vm448_vm2, %v800_v0 }
 0x285   : > { %817 = vst.msk [vmem:[#allocation4 + $0x20] sm:$0xff] %vm448_vm2, %v801_v6 }
 0x286   : > { %818 = vst.msk [vmem:[#allocation4 + $0x28] sm:$0xff] %vm448_vm2, %v802_v10 }
 0x287   : > { %819 = vst.msk [vmem:[#allocation4 + $0x30] sm:$0xff] %vm448_vm2, %v803_v15 }
 0x288   : > { %820 = vst.msk [vmem:[#allocation4 + $0x38] sm:$0xff] %vm448_vm2, %v804_v12 }
 0x289   : > { %821 = vst.msk [vmem:[#allocation4 + $0x40] sm:$0xff] %vm448_vm2, %v805_v30 }
 0x28a   : > { %822 = vst.msk [vmem:[#allocation4 + $0x48] sm:$0xff] %vm448_vm2, %v806_v17 }
 0x28b   : > { %823 = vst.msk [vmem:[#allocation4 + $0x50] sm:$0xff] %vm448_vm2, %v807_v20 }
 0x28c   : > { %824 = vst.msk [vmem:[#allocation4 + $0x58] sm:$0xff] %vm448_vm2, %v808_v22 }
 0x28d   : > { %825 = vst.msk [vmem:[#allocation4 + $0x60] sm:$0xff] %vm448_vm2, %v809_v8 }
 0x28e   : > { %826 = vst.msk [vmem:[#allocation4 + $0x68] sm:$0xff] %vm448_vm2, %v810_v18 }
 0x28f   : > { %827 = vst.msk [vmem:[#allocation4 + $0x70] sm:$0xff] %vm448_vm2, %v811_v24 }
 0x290   : > { %828 = vst.msk [vmem:[#allocation4 + $0x78] sm:$0xff] %vm448_vm2, %v812_v19 }
 0x291 LB: >> { %s1323_s30 = sshll.u32 %s1586_s23, 4  ;;  %s834_s23 = sadd.s32 1, %s1586_s23   ;;  %s1586_s23 = sphi %s1584_s23, %s834_s23   ;;  %v1582_v26 = vphi %v1580_v26, %v846_v26   ;;  %v1578_v25 = vphi %v1576_v25, %v847_v25  }
 0x292   : >> { %s838_s26 = scalar_lea.vmem [#allocation3], %s1323_s30  ;;  %s843_s28 = scalar_lea.vmem [#allocation4], %s1323_s30 }
 0x293   : >> { %v839_v27 = vld [vmem:[%s838_s26] sm:$0xff]  ;;  %v840_v28 = vld [vmem:[%s838_s26 + $0x8] sm:$0xff]  ;;  %s848_s29 = scalar_lea.vmem [#allocation5], %s1323_s30  ;;  %p831_p11 = scmp.ge.s32.totalorder %s834_s23, 8  }
 0x294   : >> { %v841_v29 = vmul.f32 %v1582_v26, %v839_v27  ;;  %v842_v32 = vmul.f32 %v1578_v25, %v840_v28  ;;  %v869_v34 = vadd.s32 (%p831_p11), 16, %v1748_v31  ;;  %v875_v36 = vadd.s32 (%p831_p11), 24, %v1748_v31  ;;  %s1590_s16 = smov (%p831_p11), 64   ;;  %s1343_s23 = sshll.u32 (%p831_p11), %s1678_s25, 3 }
 0x295   : > { %v1324_v31 = vmul.f32 (%p831_p11), -1.442695, %v1738_v9  ;;  %vm1059_vm13 = vcmask (%p831_p11), 1041409   ;;  %vm1061_vm14 = vcmask (%p831_p11), 1042434   ;;  %vm1063_vm15 = vcmask (%p831_p11), 1043459   ;;  %s1210_s25 = sshll.u32 (%p831_p11), %s404_s20, 4  ;;  %s1211_s25 = int_to_ptr.vmem [resolvable:$true] %s1210_s25 }
 0x296   : > { %1479 = vset.pattern.permute.xlu1 (%p831_p11), %v869_v34  ;;  %1478 = vset.pattern.permute.xlu0 (%p831_p11), %v869_v34  ;;  %vm1065_vm1 = vcmask (%p831_p11), 1044484   ;;  %vm1067_vm3 = vcmask (%p831_p11), 1045509   ;;  %vm1069_vm4 = vcmask (%p831_p11), 1046534   ;;  %vm1071_vm5 = vcmask (%p831_p11), 1047559   ;;  %s2006_s30 = sand.u32 (%p831_p11), 1, %s1566_s22  }
 0x297   : >> { %v844_v13 = vld [vmem:[%s843_s28] sm:$0xff]  ;;  %v845_v33 = vld [vmem:[%s843_s28 + $0x8] sm:$0xff]  ;;  %833 = sbr.rel (!%p831_p11) target bundleno = 657 (0x291), region = 113  ;;  %1481 = vset.pattern.permute.xlu2 (%p831_p11), %v869_v34  ;;  %1492 = vpow2.f32 (%p831_p11), %v1324_v31  ;;  %s1198_s26 = scalar_lea.sflag (%p831_p11), [#allocation8], %s2006_s30 }
 0x298   : >> { %v846_v26 = vadd.f32 %v844_v13, %v841_v29   ;;  %v847_v25 = vadd.f32 %v845_v33, %v842_v32  }
 0x29a   : >> { %849 = vst.msk [vmem:[%s848_s29] sm:$0xff] %vm448_vm2, %v846_v26 }
 0x29b   : >> { %850 = vst.msk [vmem:[%s848_s29 + $0x8] sm:$0xff] %vm448_vm2, %v847_v25 }
 0x29e   : > { %883 = vperm.xlu1 %1479, %v1757_v48   ;;  %871 = vperm.xlu0 %1478, %v1759_v49  }
 0x29f   : > { %895 = vperm.xlu2 %1481, %v1766_v52  }
 0x2a2   : > { %v851_v60 = vld [vmem:[#allocation5] sm:$0xff]  ;;  %v852_v62 = vld [vmem:[#allocation5 + $0x8] sm:$0xff]  ;;  %v854_v0 = vld [vmem:[#allocation5 + $0x18] sm:$0xff] }
 0x2a3   : > { %v853_v4 = vld [vmem:[#allocation5 + $0x10] sm:$0xff]  ;;  %v856_v6 = vld [vmem:[#allocation5 + $0x28] sm:$0xff]  ;;  %v858_v14 = vld [vmem:[#allocation5 + $0x38] sm:$0xff] }
 0x2a4   : > { %v857_v5 = vld [vmem:[#allocation5 + $0x30] sm:$0xff]  ;;  %v860_v10 = vld [vmem:[#allocation5 + $0x48] sm:$0xff]  ;;  %v859_v16 = vld [vmem:[#allocation5 + $0x40] sm:$0xff] }
 0x2a5   : > { %v861_v3 = vld [vmem:[#allocation5 + $0x50] sm:$0xff]  ;;  %v863_v19 = vld [vmem:[#allocation5 + $0x60] sm:$0xff]  ;;  %v864_v13 = vld [vmem:[#allocation5 + $0x68] sm:$0xff] }
 0x2a6   : > { %1480 = vset.pattern.permute.xlu1 %v875_v36  ;;  %919 = vperm.xlu0 %1478, %v1776_v54  }
 0x2a7   : > { %1482 = vset.pattern.permute.xlu2 %v875_v36 }
 0x2ae   : > { %889 = vperm.xlu1 %1480, %v1757_v48   ;;  %1484 = vset.pattern.permute.xlu0 %v875_v36  ;;  %v1493_v48 = vpop.eup %1492 }
 0x2af   : > { %901 = vperm.xlu2 %1482, %v1766_v52   ;;  %v1085_v37 = vadd.f32 1.0, %v1493_v48 }
 0x2b1   : > { %1494 = vrcp.f32 %v1085_v37  ;;  %vm1091_vm9 = vweird.f32 %v1085_v37  ;;  %v1097_v39 = vand.u32 2147483648, %v1085_v37  ;;  %v1095_v41 = vand.u32 2147483647, %v1085_v37 }
 0x2b3   : > { %vm1096_vm12 = vcmp.eq.f32.partialorder %v1095_v41, 8.507059e+37 }
 0x2b6   : > { %1483 = vset.pattern.permute.xlu1 %v869_v34  ;;  %877 = vperm.xlu0 %1484, %v1759_v49  }
 0x2b7   : > { %913 = vperm.xlu2 %1482, %v1770_v53   ;;  %v1495_v49 = vpop.eup %1494 }
 0x2b8   : > { %v1087_v52 = vmul.f32 %v1495_v49, %v1085_v37  ;;  %vm1092_vm10 = vweird.f32 %v1495_v49 }
 0x2b9   : > { %vm1093_vm11 = vmor %vm1091_vm9, %vm1092_vm10 }
 0x2be   : > { %907 = vperm.xlu1 %1483, %v1770_v53   ;;  %949 = vperm.xlu0 %1484, %v1778_v55   ;;  %v1088_v53 = vsub.f32 1.0, %v1087_v52 }
 0x2bf   : > { %1486 = vset.pattern.permute.xlu2 %v869_v34 }
 0x2c0   : > { %v1089_v38 = vmul.f32 %v1495_v49, %v1088_v53 }
 0x2c2   : > { %v1090_v40 = vadd.f32 %v1495_v49, %v1089_v38 }
 0x2c4   : > { %v1094_v42 = vsel %vm1093_vm11, %v1495_v49, %v1090_v40 }
 0x2c6   : > { %1485 = vset.pattern.permute.xlu1 %v875_v36 }
 0x2c7   : > { %931 = vperm.xlu2 %1486, %v1783_v56  }
 0x2ce   : > { %925 = vperm.xlu1 %1485, %v1776_v54   ;;  %v1098_v54 = vor.u32 1.1754944e-38, %v1097_v39  ;;  %v1355_v39 = vld [vmem:[%s1994_s9 + $0x18] sm:$0xff] }
 0x2cf   : > { %943 = vperm.xlu2 %1486, %v1778_v55   ;;  %1147 = vmatpush.bf16.msra.mxu3 %v1355_v39 }
 0x2d0   : > { %v1099_v55 = vsel %vm1096_vm12, %v1098_v54, %v1094_v42 }
 0x2d6   : > { %937 = vperm.xlu1 %1485, %v1783_v56   ;;  %v1101_v56 = vmul.f32 %v1099_v55, %v1738_v9  ;;  %v855_v9 = vld [vmem:[#allocation5 + $0x20] sm:$0xff] }
 0x2d7   : > { %1488 = vset.pattern.permute.xlu2 %v875_v36 }
 0x2de   : > { %1487 = vset.pattern.permute.xlu1 %v869_v34  ;;  %v862_v34 = vld [vmem:[#allocation5 + $0x58] sm:$0xff] }
 0x2df   : > { %961 = vperm.xlu2 %1488, %v1789_v57  }
 0x2e6   : > { %955 = vperm.xlu1 %1487, %v1789_v57  }
 0x2ee   : > { %1103 = vrot.lane.b32.xlu1 %v1101_v56, %s1590_s16  ;;  %s1208_s16 = scalar_lea.hbm %s1997_s12, %s1343_s23 }
 0x2ef   : > { %s1212_s15 = sshll.u32 %s1208_s16, 4  ;;  %s1520_s16 = scalar_lea.hbm %s1997_s12, 16  ;;  %s1213_s15 = int_to_ptr.hbm [resolvable:$true] %s1212_s15 }
 0x2f0   : > { %s1514_s23 = sshra.s32 %s1213_s15, 4  ;;  %s1515_s23 = int_to_ptr.hbm [resolvable:$true] %s1514_s23 }
 0x2f1   : > { %s1516_s28 = scalar_lea.hbm %s1515_s23, 8  ;;  %p1521_p1 = scmp.lt.s32.totalorder %s1515_s23, %s1997_s12 }
 0x2f2   : > { %p1517_p12 = scmp.ne.s32.totalorder %s1515_s23, %s1516_s28  ;;  %p1522_p2 = scmp.lt.s32.totalorder %s1520_s16, %s1516_s28 }
 0x2f4   : > { %p1518_p13 = pnand %p1517_p12, %p1695_p5  ;;  %p1523_p3 = por %p1522_p2, %p1521_p1 }
 0x2f6   : > { %p1519_p0 = pneg %p1518_p13 }
 0x2f8   : > { %p1524_p4 = pnand %p1523_p3, %p1519_p0 }
 0x2f9   : > { %v896_v43 = vpop.permute.xlu2 %895 }
 0x2fa   : > { %v967_v35 = vmul.f32 %v896_v43, %v855_v9 }
 0x2fc   : > { %v997_v28 = vsel %vm448_vm2, %v967_v35, 0.0 }
 0x309   : > { %v902_v47 = vpop.permute.xlu2 %901 }
 0x30a   : > { %v968_v20 = vmul.f32 %v902_v47, %v856_v6 }
 0x30c   : > { %v998_v29 = vsel %vm448_vm2, %v968_v20, 0.0  ;;  %v865_v20 = vld [vmem:[#allocation5 + $0x70] sm:$0xff] }
 0x30d   : > { %v999_v40 = vadd.f32 %v998_v29, %v997_v28 }
 0x310   : > { %v872_v44 = vpop.permute.xlu0 %871  ;;  %v884_v46 = vpop.permute.xlu1 %883 }
 0x311   : > { %v914_v58 = vpop.permute.xlu2 %913  ;;  %v963_v1 = vmul.f32 %v872_v44, %v851_v60  ;;  %v965_v15 = vmul.f32 %v884_v46, %v853_v4  ;;  %v1354_v44 = vld [vmem:[%s1994_s9 + $0x10] sm:$0xff] }
 0x312   : > { %v970_v8 = vmul.f32 %v914_v58, %v858_v14  ;;  %v1000_v58 = vrot.slane %v999_v40, 4  ;;  %1148 = vmatpush.bf16.msra.mxu3 %v1354_v44 }
 0x313   : > { %v979_v12 = vsel %vm448_vm2, %v963_v1, 0.0  ;;  %v988_v25 = vsel %vm448_vm2, %v965_v15, 0.0  ;;  %v1352_v15 = vld [vmem:[%s1994_s9] sm:$0xff] }
 0x314   : > { %v1007_v36 = vsel %vm448_vm2, %v970_v8, 0.0 }
 0x318   : > { %v920_v51 = vpop.permute.xlu0 %919 }
 0x319   : > { %v971_v23 = vmul.f32 %v920_v51, %v859_v16 }
 0x31b   : > { %v1015_v37 = vsel %vm448_vm2, %v971_v23, 0.0 }
 0x320   : > { %v890_v50 = vpop.permute.xlu1 %889 }
 0x321   : > { %v932_v63 = vpop.permute.xlu2 %931  ;;  %v966_v7 = vmul.f32 %v890_v50, %v854_v0 }
 0x322   : > { %v973_v31 = vmul.f32 %v932_v63, %v861_v3 }
 0x323   : > { %v989_v22 = vsel %vm448_vm2, %v966_v7, 0.0  ;;  %v866_v7 = vld [vmem:[#allocation5 + $0x78] sm:$0xff] }
 0x324   : > { %v990_v32 = vadd.f32 %v989_v22, %v988_v25  ;;  %v1024_v55 = vsel %vm448_vm2, %v973_v31, 0.0 }
 0x326   : > { %v991_v42 = vrot.slane %v990_v32, 4 }
 0x328   : > { %v878_v61 = vpop.permute.xlu0 %877  ;;  %v992_v60 = vadd.f32 %v991_v42, %v990_v32 }
 0x329   : > { %v964_v57 = vmul.f32 %v878_v61, %v852_v62  ;;  %v944_v24 = vpop.permute.xlu2 %943  ;;  %v1353_v62 = vld [vmem:[%s1994_s9 + $0x8] sm:$0xff] }
 0x32a   : > { %v975_v48 = vmul.f32 %v944_v24, %v863_v19  ;;  %1149 = vmatpush.bf16.msra.mxu3 %v1353_v62 }
 0x32b   : > { %v980_v30 = vsel %vm448_vm2, %v964_v57, 0.0  ;;  %v1001_v57 = vadd.f32 %v1000_v58, %v999_v40 }
 0x32c   : > { %v981_v18 = vadd.f32 %v980_v30, %v979_v12  ;;  %v1033_v56 = vsel %vm448_vm2, %v975_v48, 0.0 }
 0x32d   : > { %v1002_v12 = vrot.slane %v1001_v57, 2 }
 0x32e   : > { %v982_v49 = vrot.slane %v981_v18, 4  ;;  %1150 = vmatpush.bf16.msra.mxu3 %v1352_v15 }
 0x330   : > { %v908_v59 = vpop.permute.xlu1 %907  ;;  %v950_v27 = vpop.permute.xlu0 %949  ;;  %v983_v46 = vadd.f32 %v982_v49, %v981_v18  ;;  %v1003_v18 = vadd.f32 %v1002_v12, %v1001_v57 }
 0x331   : > { %v969_v17 = vmul.f32 %v908_v59, %v857_v5  ;;  %v976_v53 = vmul.f32 %v950_v27, %v864_v13  ;;  %v993_v5 = vrot.slane %v992_v60, 2 }
 0x332   : > { %v984_v0 = vrot.slane %v983_v46, 2 }
 0x333   : > { %v1006_v26 = vsel %vm448_vm2, %v969_v17, 0.0  ;;  %v1034_v50 = vsel %vm448_vm2, %v976_v53, 0.0  ;;  %v994_v17 = vadd.f32 %v993_v5, %v992_v60 }
 0x334   : > { %v1008_v52 = vadd.f32 %v1007_v36, %v1006_v26  ;;  %v1035_v63 = vadd.f32 %v1034_v50, %v1033_v56  ;;  %v985_v14 = vadd.f32 %v984_v0, %v983_v46 }
 0x335   : > { %v995_v25 = vrot.slane %v994_v17, 1 }
 0x336   : > { %v1009_v47 = vrot.slane %v1008_v52, 4  ;;  %v986_v22 = vrot.slane %v985_v14, 1 }
 0x337   : > { %v996_v36 = vadd.f32 %v995_v25, %v994_v17 }
 0x338   : > { %v1010_v1 = vadd.f32 %v1009_v47, %v1008_v52  ;;  %v987_v28 = vadd.f32 %v986_v22, %v985_v14 }
 0x339   : > { %v962_v6 = vpop.permute.xlu2 %961 }
 0x33a   : > { %v978_v30 = vmul.f32 %v962_v6, %v866_v7  ;;  %v1060_v49 = vsel %vm1059_vm13, %v996_v36, %v987_v28  ;;  %v1591_v6 = vmov 32.0  }
 0x33b   : > { %1496 = vrcp.f32 %v1591_v6 }
 0x33c   : > { %v1043_v24 = vsel %vm448_vm2, %v978_v30, 0.0 }
 0x340   : > { %v926_v11 = vpop.permute.xlu1 %925 }
 0x341   : > { %v972_v21 = vmul.f32 %v926_v11, %v860_v10  ;;  %v1036_v10 = vrot.slane %v1035_v63, 4  ;;  %v1011_v11 = vrot.slane %v1010_v1, 2  ;;  %v1497_v7 = vpop.eup %1496 }
 0x342   : > { %vm1165_vm6 = vweird.f32 %v1497_v7 }
 0x343   : > { %v1016_v33 = vsel %vm448_vm2, %v972_v21, 0.0  ;;  %v1037_v21 = vadd.f32 %v1036_v10, %v1035_v63  ;;  %v1012_v8 = vadd.f32 %v1011_v11, %v1010_v1  ;;  %v1161_v10 = vmul.f32 32.0, %v1497_v7 }
 0x344   : > { %v1017_v41 = vadd.f32 %v1016_v33, %v1015_v37  ;;  %v1004_v33 = vrot.slane %v1003_v18, 1 }
 0x345   : > { %v1038_v27 = vrot.slane %v1037_v21, 2  ;;  %v1013_v29 = vrot.slane %v1012_v8, 1  ;;  %v1162_v14 = vsub.f32 1.0, %v1161_v10 }
 0x346   : > { %v1018_v59 = vrot.slane %v1017_v41, 4 }
 0x347   : > { %v1039_v37 = vadd.f32 %v1038_v27, %v1037_v21  ;;  %v1014_v52 = vadd.f32 %v1013_v29, %v1012_v8  ;;  %v1491_v27 = vld [vmem:[%s1996_s11] ss:$0 sm:$0xff] }
 0x348   : > { %v938_v38 = vpop.permute.xlu1 %937  ;;  %v1019_v4 = vadd.f32 %v1018_v59, %v1017_v41  ;;  %v1489_v59 = vld [vmem:[%s1993_s8] ss:$0 sm:$0xff] }
 0x349   : > { %v974_v54 = vmul.f32 %v938_v38, %v862_v34  ;;  %v1005_v38 = vadd.f32 %v1004_v33, %v1003_v18  ;;  %v1040_v42 = vrot.slane %v1039_v37, 1  ;;  %v1080_v60 = vmul.f32 %v1489_v59, %v1752_v45 }
 0x34a   : > { %v1020_v16 = vrot.slane %v1019_v4, 2  ;;  %v1163_v45 = vmul.f32 %v1497_v7, %v1162_v14 }
 0x34b   : > { %v1025_v43 = vsel %vm448_vm2, %v974_v54, 0.0  ;;  %v1062_v54 = vsel %vm1061_vm14, %v1005_v38, %v1060_v49  ;;  %v1041_v47 = vadd.f32 %v1040_v42, %v1039_v37 }
 0x34c   : > { %v1026_v51 = vadd.f32 %v1025_v43, %v1024_v55  ;;  %v1021_v3 = vadd.f32 %v1020_v16, %v1019_v4  ;;  %v1064_v55 = vsel %vm1063_vm15, %v1014_v52, %v1062_v54  ;;  %v1164_v11 = vadd.f32 %v1497_v7, %v1163_v45 }
 0x34e   : > { %v1027_v61 = vrot.slane %v1026_v51, 4  ;;  %v1022_v34 = vrot.slane %v1021_v3, 1  ;;  %v1166_v15 = vsel %vm1165_vm6, %v1497_v7, %v1164_v11 }
 0x350   : > { %v1028_v9 = vadd.f32 %v1027_v61, %v1026_v51  ;;  %v1023_v39 = vadd.f32 %v1022_v34, %v1021_v3 }
 0x352   : > { %v1029_v35 = vrot.slane %v1028_v9, 2  ;;  %v1066_v43 = vsel %vm1065_vm1, %v1023_v39, %v1064_v55 }
 0x354   : > { %v1030_v26 = vadd.f32 %v1029_v35, %v1028_v9 }
 0x356   : > { %v1031_v31 = vrot.slane %v1030_v26, 1 }
 0x358   : > { %v956_v23 = vpop.permute.xlu1 %955  ;;  %v1032_v40 = vadd.f32 %v1031_v31, %v1030_v26 }
 0x359   : > { %v977_v19 = vmul.f32 %v956_v23, %v865_v20 }
 0x35a   : > { %v1068_v44 = vsel %vm1067_vm3, %v1032_v40, %v1066_v43 }
 0x35b   : > { %v1042_v13 = vsel %vm448_vm2, %v977_v19, 0.0  ;;  %v1070_v51 = vsel %vm1069_vm4, %v1041_v47, %v1068_v44  ;;  %v1490_v19 = vld [vmem:[%s1995_s10] ss:$0 sm:$0xff] }
 0x35c   : > { %v1044_v32 = vadd.f32 %v1043_v24, %v1042_v13 }
 0x35e   : > { %v1045_v48 = vrot.slane %v1044_v32, 4 }
 0x360   : > { %v1046_v53 = vadd.f32 %v1045_v48, %v1044_v32  ;;  %v1104_v61 = vpop.permute.xlu1 %1103 }
 0x362   : > { %v1047_v41 = vrot.slane %v1046_v53, 2 }
 0x364   : > { %v1048_v56 = vadd.f32 %v1047_v41, %v1046_v53 }
 0x366   : > { %v1049_v46 = vrot.slane %v1048_v56, 1 }
 0x368   : > { %v1050_v50 = vadd.f32 %v1049_v46, %v1048_v56 }
 0x36a   : > { %v1072_v58 = vsel %vm1071_vm5, %v1050_v50, %v1070_v51 }
 0x36b   : > { %1074 = vst.msk [vmem:[#allocation6] sm:$0xff] %vm448_vm2, %v1072_v58 }
 0x372   : > { %v1075_v62 = vld [vmem:[#allocation6] sm:$0xff] }
 0x373   : > { %v1081_v63 = vadd.f32 %v1080_v60, %v1075_v62 }
 0x375   : > { %v1106_v0 = vmul.f32 %v1104_v61, %v1081_v63 }
 0x377   : > { %v1107_v1 = vpack.c.bf16 %v1106_v0, %v1106_v0 }
 0x379   : > { %1341 = vmatmul.msk.bf16.vlgmr.msra.gmra.mxu3 %vm448_vm2, %v1107_v1 }
 0x3fc   : > { %v1152_v57 = vpop.f32.mrf.mxu3 }
 0x3fd   : > { %v1156_v4 = vadd.f32 %v1152_v57, %v1721_v2 }
 0x3ff   : > { %v1157_v5 = vsel %vm428_vm0, %v1156_v4, 0.0 }
 0x400   : > { %1158 = vadd.xlane.f32.xlu2 %v1157_v5 }
 0x404   : > { %v1154_v9 = vpop.f32.mrf.mxu3 }
 0x473   : > { %v1159_v12 = vpop.xlane.xlu2 %1158 }
 0x474   : > { %v1167_v16 = vmul.f32 %v1166_v15, %v1159_v12 }
 0x476   : > { %v1168_v30 = vsub.f32 %v1156_v4, %v1167_v16 }
 0x478   : > { %v1169_v17 = vmul.f32 %v1168_v30, %v1168_v30 }
 0x47a   : > { %v1170_v2 = vsel %vm428_vm0, %v1169_v17, 0.0 }
 0x47b   : > { %1171 = vadd.xlane.f32.xlu0 %v1170_v2 }
 0x4ee   : > { %v1172_v35 = vpop.xlane.xlu0 %1171 }
 0x4ef   : > { %v1173_v20 = vmul.f32 %v1172_v35, %v1166_v15 }
 0x4f1   : > { %v1174_v21 = vadd.f32 1e-05, %v1173_v20 }
 0x4f3   : > { %1498 = vrsqrt.f32 %v1174_v21  ;;  %vm1181_vm7 = vweird.f32 %v1174_v21 }
 0x4f9   : > { %v1499_v22 = vpop.eup %1498 }
 0x4fa   : > { %v1176_v8 = vmul.f32 %v1499_v22, %v1174_v21  ;;  %vm1182_vm2 = vweird.f32 %v1499_v22 }
 0x4fb   : > { %vm1183_vm8 = vmor %vm1181_vm7, %vm1182_vm2 }
 0x4fc   : > { %v1177_v23 = vmul.f32 %v1499_v22, %v1176_v8 }
 0x4fe   : > { %v1178_v18 = vmul.f32 0.5, %v1177_v23 }
 0x500   : > { %v1179_v3 = vsub.f32 1.5, %v1178_v18 }
 0x502   : > { %v1180_v24 = vmul.f32 %v1499_v22, %v1179_v3 }
 0x504   : > { %v1184_v25 = vsel %vm1183_vm8, %v1499_v22, %v1180_v24 }
 0x505   : > { %v1185_v26 = vmul.f32 %v1184_v25, %v1168_v30 }
 0x507   : > { %v1190_v13 = vmul.f32 %v1490_v19, %v1185_v26 }
 0x509   : > { %v1195_v28 = vadd.f32 %v1491_v27, %v1190_v13 }
 0x50b   : > { %1196 = vst.msk [vmem:[%s404_s20] sm:$0xff] %vm428_vm0, %v1195_v28 }
 0x50c   : > { %1527 = shalt.err (!%p1524_p4)
}
 0x50d   : > { %1356 = dma.vmem_to_hbm [thread:$0]  (%p1695_p5), %s1211_s25, 128, %s1213_s15, %s1198_s26  }
 0x50e PF: > { %p1362_p7 = scmp.ge.s32.totalorder %s1574_s24, 2  ;;  %s1224_s18 = sand.u32 1, %s1562_s21  }
 0x50f   : > { %s1225_s20 = scalar_lea.sflag [#allocation8], %s1224_s18 }
 0x510   : > { %p1359_p8 = pnand %p1362_p7, %p1699_p6 }
 0x512   : > { %p1360_p9 = pneg %p1359_p8 }
 0x514   : > { %1557 = dma.done.wait (%p1360_p9), %s1225_s20, 128  }
 0x515   : > { %1559 = vsyncadd (%p1360_p9), %s1225_s20, 4294967168  ;;  %s2007_s0 = sld [smem:[#allocation10_spill]]  ;;  %p22_p10 = scmp.ge.s32.totalorder %s1682_s27, 4  }
 0x516   : > { %s2008_s23 = sld [smem:[#allocation11_spill]]  ;;  %s2009_s21 = smov %s1566_s22 }
 0x517   : > { %s2011_s24 = smov %s1682_s27  ;;  %24 = sbr.rel (!%p22_p10) target bundleno = 5 (0x5), region = 124 }
 0x51b   : > { %s2010_s22 = smov %s2007_s0 }
 0x51c   :  { %1231 = vsyncpa [#allocation8], 1 }
 0x51d   :  { %1233 = vsyncpa [#allocation8 + $0x1], 1 }

</bundles_post_ra>
